<compile_context>
chip_gen: v6e
topology: v6e:2x2x1
jax: 0.10.0
libtpu: 0.0.40
codegen_flags: <defaults>
</compile_context>

<pallas_src>
import functools

import jax
import jax.numpy as jnp
import numpy as np
from jax.experimental import pallas as pl
from jax.experimental.pallas import tpu as pltpu

_SUBLANE = 8
_VMEM_TILE_BUDGET = 40 * 1024 * 1024     # tile-sizing budget (safe on all gens)
_VMEM_LIMIT_BYTES = 48 * 1024 * 1024     # scoped VMEM limit (< v7x 64 MiB physical)
_MAX_TILE_ROWS = 4096                    # diminishing returns beyond this


def _round_up(v, m):
    return ((v + m - 1) // m) * m


def _choose_row_tile(n, in_dim, out_dim, x_bytes, out_bytes, w_bytes):
    """Largest row tile (multiple of 8) fitting the VMEM budget when
    double-buffered, then shrunk so the grid has >= 2 (preferably an even
    number of) steps so both v7x TensorCores get work."""
    if n <= _SUBLANE:
        return n                                           # full-extent block
    resident = 2 * (in_dim * out_dim * w_bytes + out_dim * 4)   # fused W + bias
    per_row = 2 * (in_dim * x_bytes + out_dim * out_bytes)      # dbl-buffered x+out
    avail = max(_VMEM_TILE_BUDGET - resident, _SUBLANE * per_row)
    tn = min(int(avail // per_row), _MAX_TILE_ROWS)
    tn = max(_SUBLANE, (tn // _SUBLANE) * _SUBLANE)
    if tn >= n:                                    # force >= 2 grid steps (v7x)
        tn = max(_SUBLANE, _round_up(pl.cdiv(n, 2), _SUBLANE))
        if tn >= n:                                # too small to split on sublanes
            return n
    steps = pl.cdiv(n, tn)
    if steps > 2 and steps % 2 == 1:               # prefer an even step count
        tn_even = max(_SUBLANE, _round_up(pl.cdiv(n, steps + 1), _SUBLANE))
        if pl.cdiv(n, tn_even) % 2 == 0:
            tn = tn_even
    return tn


def _leaf_kernel(x_ref, w_ref, b_ref, out_ref, *, mem_dim):
    """One fused MXU matmul + sigmoid/tanh (EUP, f32) + mul (VPU) + store."""
    x = x_ref[...]                                          # (tn, in_dim)
    if x.dtype != w_ref.dtype:                              # match MXU input dtype
        x = x.astype(w_ref.dtype)
    # z = x @ [Wc | Wo] + [bc | bo]  ->  z[:, :m] = c_pre, z[:, m:] = o_pre
    z = jnp.dot(x, w_ref[...], preferred_element_type=jnp.float32) + b_ref[...]
    c = z[:, :mem_dim]
    o = jax.nn.sigmoid(z[:, mem_dim:])
    h = o * jnp.tanh(c)
    if mem_dim % 128 == 0:
        # Both halves lane-aligned: two full unmasked stores, no concat temp.
        out_ref[:, :mem_dim] = h.astype(out_ref.dtype)
        out_ref[:, mem_dim:] = c.astype(out_ref.dtype)
    else:
        # out = [h | c]  (state_bundle(h, c))
        out_ref[...] = jnp.concatenate([h, c], axis=-1).astype(out_ref.dtype)


def prepare_leaf_params(wc, bc, wo, bo, param_dtype=None):
    """Fuse the two Linears once at parameter-prep time (not per forward call).

    wc/wo are stored transposed vs. PyTorch, i.e. (in_dim, mem_dim); bc/bo (mem_dim,).
    Returns w_fused (in_dim, 2*mem_dim) [optionally cast, e.g. bf16] and
    b_fused (1, 2*mem_dim) in f32 (bias is added post-matmul in f32).
    """
    w_fused = jnp.concatenate([wc, wo], axis=1)
    if param_dtype is not None:
        w_fused = w_fused.astype(param_dtype)
    b_fused = jnp.concatenate([bc, bo], axis=0).reshape(1, -1).astype(jnp.float32)
    return w_fused, b_fused


@jax.jit
def binary_tree_leaf_forward(seq_inputs, w_fused, b_fused):
    """seq_inputs: (seq, batch, in_dim) -> (seq, batch, 2*mem_dim)."""
    seq, batch, in_dim = seq_inputs.shape
    out_dim = w_fused.shape[1]
    mem_dim = out_dim // 2
    n = seq * batch

    x2d = seq_inputs.reshape(n, in_dim)        # contiguous reshape: no HBM pass

    x_bytes = jnp.dtype(seq_inputs.dtype).itemsize
    w_bytes = jnp.dtype(w_fused.dtype).itemsize
    tn = _choose_row_tile(n, in_dim, out_dim, x_bytes, x_bytes, w_bytes)
    grid = (pl.cdiv(n, tn),)                   # ragged last block: no pad, no slice

    cost = pl.CostEstimate(
        flops=2 * n * in_dim * out_dim,
        transcendentals=2 * n * mem_dim,                      # sigmoid + tanh
        bytes_accessed=(n * in_dim * x_bytes + n * out_dim * x_bytes
                        + in_dim * out_dim * w_bytes + out_dim * 4),
    )

    out2d = pl.pallas_call(
        functools.partial(_leaf_kernel, mem_dim=mem_dim),
        out_shape=jax.ShapeDtypeStruct((n, out_dim), seq_inputs.dtype),
        grid=grid,
        in_specs=[
            pl.BlockSpec((tn, in_dim), lambda i: (i, 0)),      # x tile (pipelined)
            pl.BlockSpec((in_dim, out_dim), lambda i: (0, 0)), # fused W, VMEM-resident
            pl.BlockSpec((1, out_dim), lambda i: (0, 0)),      # fused bias, VMEM-resident
        ],
        out_specs=pl.BlockSpec((tn, out_dim), lambda i: (i, 0)),
        compiler_params=pltpu.CompilerParams(
            dimension_semantics=("parallel",),                 # shard rows across TCs
            vmem_limit_bytes=_VMEM_LIMIT_BYTES,
        ),
        cost_estimate=cost,
    )(x2d, w_fused, b_fused)

    return out2d.reshape(seq, batch, out_dim)


def _reference(seq_inputs, wc, bc, wo, bo):
    """Plain-JAX (f32) reference matching the PyTorch module."""
    x = seq_inputs.astype(jnp.float32)
    c = jnp.einsum("sbi,im->sbm", x, wc.astype(jnp.float32)) + bc
    o = jax.nn.sigmoid(jnp.einsum("sbi,im->sbm", x, wo.astype(jnp.float32)) + bo)
    h = o * jnp.tanh(c)
    return jnp.concatenate([h, c], axis=-1)


if __name__ == "__main__":
    seq, batch, in_dim, mem_dim = 8, 2, 32, 32

    key = jax.random.PRNGKey(0)
    k_x, k_wc, k_bc, k_wo, k_bo, k_x2 = jax.random.split(key, 6)

    # PyTorch-Linear-style uniform init: U(-1/sqrt(in_dim), 1/sqrt(in_dim)).
    bound = 1.0 / np.sqrt(in_dim)
    seq_inputs = jax.random.normal(k_x, (seq, batch, in_dim), dtype=jnp.float32)
    wc = jax.random.uniform(k_wc, (in_dim, mem_dim), jnp.float32, -bound, bound)
    bc = jax.random.uniform(k_bc, (mem_dim,), jnp.float32, -bound, bound)
    wo = jax.random.uniform(k_wo, (in_dim, mem_dim), jnp.float32, -bound, bound)
    bo = jax.random.uniform(k_bo, (mem_dim,), jnp.float32, -bound, bound)

    # --- f32 path: exact semantics check (tight tolerance) ---
    w_f32, b_f32 = prepare_leaf_params(wc, bc, wo, bo)            # fuse once
    out = jax.block_until_ready(binary_tree_leaf_forward(seq_inputs, w_f32, b_f32))
    assert out.shape == (seq, batch, 2 * mem_dim), out.shape
    np.testing.assert_allclose(
        np.asarray(out), np.asarray(_reference(seq_inputs, wc, bc, wo, bo)),
        rtol=1e-5, atol=1e-5)

    # --- bf16 I/O path, multi-tile grid with a ragged last block (N = 77*13 = 1001) ---
    seq2, batch2 = 77, 13
    x_big = jax.random.normal(
        k_x2, (seq2, batch2, in_dim), dtype=jnp.float32).astype(jnp.bfloat16)
    w_bf, b_bf = prepare_leaf_params(wc, bc, wo, bo, param_dtype=jnp.bfloat16)
    out_big = jax.block_until_ready(binary_tree_leaf_forward(x_big, w_bf, b_bf))
    ref_big = _reference(x_big, w_bf[:, :mem_dim], bc, w_bf[:, mem_dim:], bo)
    np.testing.assert_allclose(
        np.asarray(out_big, dtype=np.float32), np.asarray(ref_big),
        rtol=3e-2, atol=3e-2)

    print("KERNEL_OK")
</pallas_src>

<mosaic_0001>
module attributes {stable_mosaic.version = 11 : i64} {
  func.func @_leaf_kernel(%arg0: i32, %arg1: memref<8x32xf32, #tpu.memory_space<vmem>>, %arg2: memref<32x64xf32, #tpu.memory_space<vmem>>, %arg3: memref<1x64xf32, #tpu.memory_space<vmem>>, %arg4: memref<8x64xf32, #tpu.memory_space<vmem>>) attributes {dimension_semantics = [#tpu.dimension_semantics<parallel>], iteration_bounds = array<i64: 2>, scalar_prefetch = 0 : i64, scratch_operands = 0 : i64, tpu.core_type = #tpu.core_type<tc>, window_params = [{transform_indices = @transform_0, window_bounds = array<i64: 8, 32>}, {pipeline_mode = #tpu.pipeline_mode<synchronous>, transform_indices = @transform_1, window_bounds = array<i64: 32, 64>}, {pipeline_mode = #tpu.pipeline_mode<synchronous>, transform_indices = @transform_2, window_bounds = array<i64: 1, 64>}, {transform_indices = @transform_3, window_bounds = array<i64: 8, 64>}]} {
    %c0 = arith.constant 0 : index
    %c0_0 = arith.constant 0 : index
    %0 = vector.load %arg1[%c0, %c0_0] : memref<8x32xf32, #tpu.memory_space<vmem>>, vector<8x32xf32>
    %c0_1 = arith.constant 0 : index
    %c0_2 = arith.constant 0 : index
    %1 = vector.load %arg2[%c0_1, %c0_2] : memref<32x64xf32, #tpu.memory_space<vmem>>, vector<32x64xf32>
    %cst = arith.constant dense<0.000000e+00> : vector<8x64xf32>
    %2 = tpu.matmul %0, %1, %cst {dimension_numbers = #tpu.dot_dimension_numbers<[1], [0], [0], [1], [0, 0, 1, 1], [], []>} : vector<8x32xf32>, vector<32x64xf32>, vector<8x64xf32> -> vector<8x64xf32>
    %c0_3 = arith.constant 0 : index
    %c0_4 = arith.constant 0 : index
    %3 = vector.load %arg3[%c0_3, %c0_4] : memref<1x64xf32, #tpu.memory_space<vmem>>, vector<1x64xf32>
    %4 = vector.broadcast %3 : vector<1x64xf32> to vector<8x64xf32>
    %5 = arith.addf %2, %4 : vector<8x64xf32>
    %6 = vector.extract_strided_slice %5 {offsets = [0, 0], sizes = [8, 32], strides = [1, 1]} : vector<8x64xf32> to vector<8x32xf32>
    %7 = vector.extract_strided_slice %5 {offsets = [0, 32], sizes = [8, 32], strides = [1, 1]} : vector<8x64xf32> to vector<8x32xf32>
    %8 = arith.negf %7 : vector<8x32xf32>
    %9 = math.exp %8 : vector<8x32xf32>
    %cst_5 = arith.constant 1.000000e+00 : f32
    %10 = vector.broadcast %cst_5 : f32 to vector<8x32xf32>
    %11 = arith.addf %10, %9 : vector<8x32xf32>
    %12 = arith.divf %10, %11 : vector<8x32xf32>
    %13 = math.tanh %6 : vector<8x32xf32>
    %14 = arith.mulf %12, %13 : vector<8x32xf32>
    %15 = tpu.concatenate %14, %6 in 1 : vector<8x32xf32>, vector<8x32xf32> -> vector<8x64xf32>
    %c0_6 = arith.constant 0 : index
    %c0_7 = arith.constant 0 : index
    %16 = vector.load %arg4[%c0_6, %c0_7] : memref<8x64xf32, #tpu.memory_space<vmem>>, vector<8x64xf32>
    tpu.vector_store %arg4[%c0_6, %c0_7], %15 {strides = array<i32>} : memref<8x64xf32, #tpu.memory_space<vmem>>, vector<8x64xf32>,
    return
  }
  func.func @transform_0(%arg0: i32) -> (i32, i32) {
    %c0_i32 = arith.constant 0 : i32
    %c0_i32_0 = arith.constant 0 : i32
    return %arg0, %c0_i32 : i32, i32
  }
  func.func @transform_1(%arg0: i32) -> (i32, i32) {
    %c0_i32 = arith.constant 0 : i32
    %c0_i32_0 = arith.constant 0 : i32
    %c0_i32_1 = arith.constant 0 : i32
    return %c0_i32, %c0_i32_0 : i32, i32
  }
  func.func @transform_2(%arg0: i32) -> (i32, i32) {
    %c0_i32 = arith.constant 0 : i32
    %c0_i32_0 = arith.constant 0 : i32
    %c0_i32_1 = arith.constant 0 : i32
    return %c0_i32, %c0_i32_0 : i32, i32
  }
  func.func @transform_3(%arg0: i32) -> (i32, i32) {
    %c0_i32 = arith.constant 0 : i32
    %c0_i32_0 = arith.constant 0 : i32
    return %arg0, %c0_i32 : i32, i32
  }
}

</mosaic_0001>

<bundles_post_ra>
// kernel: binary_tree_leaf_forward.1
= control target key start
LH: loop header
LB: loop body
LE: loop exit
PB: predicated region body
PF: predicated region fallthrough
CT: control target
= control target key end

     0   :  { %8 = vsyncpa [#allocation3], 0  ;;  %s828_s0 = inlined_call_operand.hbm [shape: f32[16,32], index: 0, kind: input, shape index: {}]   ;;  %s829_s1 = inlined_call_operand.hbm [shape: f32[32,64], index: 1, kind: input, shape index: {}]   ;;  %s830_s2 = inlined_call_operand.vmem [shape: f32[1,64], index: 2, kind: input, shape index: {}]   ;;  %s831_s3 = inlined_call_operand.hbm [shape: f32[16,64], index: 3, kind: output, shape index: {}]  }
   0x1   :  { %10 = vsyncpa [#allocation3 + $0x1], 0 }
   0x2   :  { %11 = vsyncpa [#allocation6], 0 }
   0x3   :  { %12 = vsyncpa [#allocation4], 0 }
   0x4   :  { %14 = vsyncpa [#allocation4 + $0x1], 0  ;;  %s659_s12 = smov 0   ;;  %s661_s13 = smov 0  }
   0x5   :  { %s663_s14 = smov 0   ;;  %s665_s15 = smov 0  }
   0x6 LB: > { %s680_s16 = sadd.s32 4294967295, %s628_s15   ;;  %s404_s17 = sadd.s32 4294967294, %s628_s15   ;;  %s628_s15 = sphi %s665_s15, %s853_s15   ;;  %s624_s14 = sphi %s663_s14, %s852_s14   ;;  %s620_s13 = sphi %s661_s13, %s851_s13   ;;  %s616_s12 = sphi %s659_s12, %s850_s12  }
   0x7   : > { %p40_p0 = scmp.ne.s32.totalorder %s620_s13, %s616_s12  ;;  %p832_p1 = scmp.eq.s32.totalorder %s680_s16, 0 }
   0x8   : > { %p112_p3 = scmp.eq.s32.totalorder %s404_s17, 1  ;;  %p405_p5 = scmp.ge.s32.totalorder %s628_s15, 1 }
   0x9   : > { %p689_p4 = por %p832_p1, %p40_p0  ;;  %p119_p7 = scmp.lt.s32.totalorder %s628_s15, 3 }
   0xa   : > { %p694_p6 = por %p112_p3, %p40_p0  ;;  %s630_s21 = smov [#allocation5]  }
   0xb   : > { %s836_s18 = scalar_select %p689_p4, 1, 0 }
   0xc   : > { %s837_s19 = scalar_select %p694_p6, 1, 0 }
   0xd   : > { %p699_p8 = pnand %p405_p5, %p119_p7  ;;  %s131_s22 = sshll.u32 %s630_s21, 4  ;;  %s132_s22 = int_to_ptr.vmem [resolvable:$true] %s131_s22 }
   0xe   : > { %s713_s24 = sadd.s32 1, %s628_s15   ;;  %s27_s25 = sadd.s32 1, %s624_s14 }
   0xf   : > { %s838_s20 = scalar_select %p699_p8, 1, 0 }
  0x10   : > { %p445_p9 = pneg %p699_p8  ;;  %s24_s26 = ssub.s32 %s628_s15, %s713_s24 }
  0x11   : > { %s517_s27 = scalar_lea.vmem %s132_s22, 512  ;;  %p525_p5 = scmp.lt.s32.totalorder %s132_s22, %s132_s22 }
  0x12   : > { %p708_p11 = pnand %p445_p9, %p832_p1  ;;  %p518_p13 = scmp.ne.s32.totalorder %s132_s22, %s517_s27 }
  0x13   : > { %p526_p7 = scmp.lt.s32.totalorder %s517_s27, %s517_s27 }
  0x14   : > { %p508_p12 = pneg %p708_p11 }
  0x15   : > { %p527_p10 = por %p526_p7, %p525_p5 }
  0x16   : > { %p520_p0 = pnand %p518_p13, %p508_p12 }
  0x18   : > { %p521_p3 = pneg %p520_p0 }
  0x1a   : > { %p528_p2 = pnand %p527_p10, %p521_p3 }
  0x1c   : > { %531 = shalt.err (!%p528_p2)
}
  0x1d   : > { %s631_s28 = smov 128   ;;  %s632_s29 = smov 8  }
  0x1e   : > { %448 = dma.hbm_to_vmem [thread:$0]  (!%p708_p11), %s829_s1, 512, %s132_s22, [#allocation6], %s631_s28, %s631_s28, %s632_s29  }
  0x1f   : > { %p25_p9 = scmp.eq.s32.totalorder %s24_s26, 0  ;;  %p34_p12 = scmp.ne.s32.totalorder %s624_s14, %s620_s13 }
  0x20   : > { %p35_p10 = scmp.eq.s32.totalorder %s628_s15, 0  ;;  %p458_p2 = scmp.lt.s32.totalorder %s628_s15, 2 }
  0x21   : > { %s730_s5 = scalar_select %p25_p9, %s624_s14, %s27_s25  }
  0x22   : > { %p36_p13 = por %p35_p10, %p34_p12  ;;  %p840_p0 = scmp.eq.s32.totalorder %s680_s16, 1 }
  0x23   : > { %s148_s7 = sand.u32 1, %s624_s14   ;;  %s409_s8 = sshll.u32 %s628_s15, 7 }
  0x24   : > { %p734_p3 = por %p840_p0, %p34_p12  ;;  %s408_s9 = sshll.u32 %s148_s7, 3 }
  0x25   : > { %s743_s17 = scalar_lea.hbm %s828_s0, %s409_s8  ;;  %s152_s21 = scalar_lea.vmem [#allocation2], %s408_s9 }
  0x26   : > { %s841_s6 = scalar_select %p734_p3, 1, 0 }
  0x27   : > { %s159_s22 = sshll.u32 %s152_s21, 4  ;;  %p745_p11 = pnand %p458_p2, %p36_p13  ;;  %s160_s22 = int_to_ptr.vmem [resolvable:$true] %s159_s22 }
  0x28   : > { %s149_s25 = scalar_lea.sflag [#allocation3], %s148_s7  ;;  %s532_s26 = scalar_lea.hbm %s743_s17, 128 }
  0x29   : > { %p533_p5 = scmp.ne.s32.totalorder %s743_s17, %s532_s26  ;;  %p534_p7 = pneg %p745_p11 }
  0x2a   : > { %s537_s29 = scalar_lea.hbm %s828_s0, 256  ;;  %p538_p10 = scmp.lt.s32.totalorder %s743_s17, %s828_s0 }
  0x2b   : > { %p535_p9 = pnand %p534_p7, %p533_p5  ;;  %p539_p2 = scmp.lt.s32.totalorder %s537_s29, %s532_s26 }
  0x2d   : > { %p536_p12 = pneg %p535_p9  ;;  %p540_p13 = por %p539_p2, %p538_p10 }
  0x2f   : > { %p541_p0 = pnand %p540_p13, %p536_p12 }
  0x31   : > { %544 = shalt.err (!%p541_p0)
}
  0x32   : > { %s545_s8 = scalar_lea.vmem %s160_s22, 128  ;;  %s633_s7 = smov [#allocation2]  }
  0x33   : > { %p546_p1 = scmp.ne.s32.totalorder %s160_s22, %s545_s8  ;;  %s550_s9 = sshll.u32 %s633_s7, 4  ;;  %s551_s9 = int_to_ptr.vmem [resolvable:$false] %s550_s9 }
  0x34   : > { %s552_s10 = scalar_lea.vmem %s551_s9, 256  ;;  %p553_p5 = scmp.lt.s32.totalorder %s160_s22, %s551_s9 }
  0x35   : > { %p548_p6 = pnand %p546_p1, %p534_p7  ;;  %p554_p9 = scmp.lt.s32.totalorder %s552_s10, %s545_s8 }
  0x37   : > { %p549_p3 = pneg %p548_p6  ;;  %p555_p4 = por %p554_p9, %p553_p5 }
  0x39   : > { %p556_p8 = pnand %p555_p4, %p549_p3 }
  0x3b   : > { %559 = shalt.err (!%p556_p8)
}
  0x3c   : > { %452 = dma.hbm_to_vmem [thread:$0]  (!%p745_p11), %s743_s17, 128, %s160_s22, %s149_s25  }
  0x3d   : > { %p843_p12 = scmp.ne.s32.totalorder %s838_s20, 0 }
  0x3e   : > { %s766_s11 = sand.u32 (!%p843_p12), 1, %s620_s13   ;;  %p844_p1 = scmp.ne.s32.totalorder (!%p843_p12), %s836_s18, 0 }
  0x3f   : > { %168 = sbr.rel (%p843_p12) target bundleno = 536 (0x218), region = 32  ;;  %s411_s21 = sshll.u32 (!%p843_p12), %s766_s11, 3 }
  0x40   : > { %s171_s26 = scalar_lea.sflag (!%p843_p12), [#allocation3], %s766_s11  ;;  %s174_s27 = scalar_lea.vmem (!%p843_p12), [#allocation2], %s411_s21 }
  0x44   : > { %603 = dma.done.wait (%p844_p1), %s171_s26, 128  }
  0x45   : > { %605 = vsyncadd (%p844_p1), %s171_s26, 4294967168  ;;  %p845_p4 = scmp.eq.s32.totalorder %s680_s16, 0 }
  0x47   : > { %607 = dma.done.wait (%p845_p4), [#allocation6], 512   ;;  %p846_p6 = pmov %p845_p4 }
  0x48   : > { %v634_v0 = vmov 0.0   ;;  %vm635_vm0 = vmmov 0   ;;  %v205_v1 = vld [vmem:[#allocation5 + $0x18] sm:$0xff]  ;;  %v204_v2 = vld [vmem:[#allocation5 + $0x10] sm:$0xff]  ;;  %v203_v3 = vld [vmem:[#allocation5 + $0x8] sm:$0xff]  ;;  %vm213_vm1 = vcmask 261120  }
  0x49   : > { %609 = vsyncadd (%p846_p6), [#allocation6], 4294966784  ;;  %426 = vmatprep.subr.mxu0 %v634_v0  ;;  %434 = vmatprep.mubr.msk.f32.mxu0 %vm635_vm0, %v634_v0  ;;  %v202_v4 = vld [vmem:[#allocation5] sm:$0xff]  ;;  %v201_v5 = vld [vmem:[%s174_s27] sm:$0xff]  ;;  %s636_s17 = smov 32   ;;  %s637_s22 = smov 96  }
  0x4a   : > { %427 = vmatpush3.msra.mxu0 %v205_v1  ;;  %v414_v6 = vld [vmem:[%s830_s2] ss:$0 sm:$0xff]  ;;  %s418_s23 = sshll.u32 %s680_s16, 7  ;;  %s200_s25 = scalar_lea.vmem [#allocation7], %s411_s21  ;;  %vm308_vm2 = vcmask 523264  }
  0x4b   : > { %428 = vmatprep.subr.mxu0 %v634_v0  ;;  %s324_s28 = sshll.u32 %s200_s25, 4  ;;  %s790_s4 = scalar_lea.hbm %s831_s3, %s418_s23  ;;  %s325_s28 = int_to_ptr.vmem [resolvable:$true] %s324_s28 }
  0x4c   : > { %429 = vmatpush3.msra.mxu0 %v204_v2  ;;  %s311_s8 = scalar_lea.sflag [#allocation4], %s766_s11  ;;  %s560_s7 = scalar_lea.vmem %s325_s28, 128 }
  0x4d   : > { %430 = vmatprep.subr.mxu0 %v634_v0  ;;  %p561_p8 = scmp.ne.s32.totalorder %s325_s28, %s560_s7  ;;  %p847_p3 = scmp.ne.s32.totalorder %s841_s6, 0 }
  0x4e   : > { %431 = vmatpush3.msra.mxu0 %v203_v3  ;;  %s638_s16 = smov [#allocation7]  }
  0x4f   : > { %432 = vmatprep.subr.mxu0 %v634_v0  ;;  %p562_p11 = pnand %p561_p8, %p847_p3  ;;  %s564_s9 = sshll.u32 %s638_s16, 4  ;;  %s565_s9 = int_to_ptr.vmem [resolvable:$false] %s564_s9 }
  0x50   : > { %433 = vmatpush3.msra.mxu0 %v202_v4  ;;  %s566_s10 = scalar_lea.vmem %s565_s9, 256  ;;  %p567_p10 = scmp.lt.s32.totalorder %s325_s28, %s565_s9 }
  0x51   : > { %435 = vmatmul.mubr.msk.f32.vlgmr.msra.gmra.mxu0 %vm213_vm1, %v201_v5  ;;  %p563_p7 = pneg %p562_p11  ;;  %p568_p2 = scmp.lt.s32.totalorder %s566_s10, %s560_s7 }
  0x53   : > { %p569_p13 = por %p568_p2, %p567_p10 }
  0x55   : > { %p570_p0 = pnand %p569_p13, %p563_p7 }
 0x111   : > { %v283_v7 = vpop.f32.mrf.mxu0 }
 0x112   : > { %v284_v8 = vadd.f32 %v414_v6, %v283_v7 }
 0x113   : > { %v436_v9 = vpop.f32.mrf.mxu0 }
 0x114   : > { %500 = vtanh.f32 %v284_v8  ;;  %304 = vrot.lane.b32.xlu1 %v284_v8, %s636_s17  ;;  %v416_v11 = vmul.f32 -1.442695, %v284_v8 }
 0x116   : > { %502 = vpow2.f32 %v416_v11 }
 0x121   : > { %v501_v10 = vpop.eup %500 }
 0x122   : > { %295 = vrot.lane.b32.xlu0 %v501_v10, %s636_s17 }
 0x123   : > { %v503_v12 = vpop.eup %502 }
 0x124   : > { %v290_v13 = vadd.f32 1.0, %v503_v12 }
 0x126   : > { %504 = vrcp.f32 %v290_v13 }
 0x133   : > { %v505_v14 = vpop.eup %504 }
 0x186   : > { %v305_v17 = vpop.permute.xlu1 %304 }
 0x194   : > { %v296_v15 = vpop.permute.xlu0 %295 }
 0x195   : > { %v298_v16 = vmul.f32 %v505_v14, %v296_v15 }
 0x197   : > { %300 = vrot.lane.b32.xlu0 %v298_v16, %s637_s22 }
 0x209   : > { %v301_v18 = vpop.permute.xlu0 %300 }
 0x20a   : > { %v307_v19 = vsel %vm213_vm1, %v301_v18, %v305_v17 }
 0x20b   : > { %309 = vst.msk [vmem:[%s200_s25] sm:$0xff] %vm308_vm2, %v307_v19 }
 0x20c   : > { %573 = shalt.err (!%p570_p0)
}
 0x20d   : > { %s574_s21 = scalar_lea.hbm %s790_s4, 128  ;;  %s578_s27 = scalar_lea.hbm %s831_s3, 256 }
 0x20e   : > { %p575_p5 = scmp.ne.s32.totalorder %s790_s4, %s574_s21  ;;  %p579_p1 = scmp.lt.s32.totalorder %s790_s4, %s831_s3 }
 0x20f   : > { %p580_p4 = scmp.lt.s32.totalorder %s578_s27, %s574_s21 }
 0x210   : > { %p576_p9 = pnand %p575_p5, %p847_p3 }
 0x211   : > { %p581_p6 = por %p580_p4, %p579_p1 }
 0x212   : > { %p577_p12 = pneg %p576_p9 }
 0x214   : > { %p582_p8 = pnand %p581_p6, %p577_p12 }
 0x216   : > { %585 = shalt.err (!%p582_p8)
}
 0x217   : > { %443 = dma.vmem_to_hbm [thread:$0]  (%p847_p3), %s325_s28, 128, %s790_s4, %s311_s8  }
 0x218 PF: > { %s336_s17 = sand.u32 1, %s616_s12   ;;  %p848_p11 = scmp.ne.s32.totalorder %s837_s19, 0 }
 0x219   : > { %p849_p7 = scmp.ge.s32.totalorder %s628_s15, 2  ;;  %s337_s22 = scalar_lea.sflag [#allocation4], %s336_s17 }
 0x21b   : > { %p454_p10 = pnand %p849_p7, %p848_p11 }
 0x21d   : > { %p455_p2 = pneg %p454_p10 }
 0x21f   : > { %611 = dma.done.wait (%p455_p2), %s337_s22, 128  }
 0x220   : > { %613 = vsyncadd (%p455_p2), %s337_s22, 4294967168  ;;  %p17_p13 = scmp.ge.s32.totalorder %s713_s24, 4   ;;  %s850_s12 = smov %s620_s13 }
 0x221   : > { %s851_s13 = smov %s624_s14  ;;  %s852_s14 = smov %s730_s5 }
 0x222   : > { %s853_s15 = smov %s713_s24  ;;  %19 = sbr.rel (!%p17_p13) target bundleno = 6 (0x6), region = 81 }
 0x227   :  { %342 = vsyncpa [#allocation3], 1 }
 0x228   :  { %344 = vsyncpa [#allocation3 + $0x1], 1 }
 0x229   :  { %345 = vsyncpa [#allocation6], 1 }
 0x22a   :  { %346 = vsyncpa [#allocation4], 1 }
 0x22b   :  { %348 = vsyncpa [#allocation4 + $0x1], 1 }

</bundles_post_ra>
